<compile_context>
chip_gen: v7x
topology: tpu7x:2x2x1
jax: 0.10.0
libtpu: 0.0.40
codegen_flags: <defaults>
</compile_context>

<pallas_src>
import math

import numpy as np

import jax
import jax.numpy as jnp
from jax.experimental import pallas as pl
from jax.experimental.pallas import tpu as pltpu


# ---------------------------------------------------------------------------
# Kernel 1: node-feature projection  HW = H @ W^T   (W pre-transposed, padded)
# ---------------------------------------------------------------------------
def _project_kernel(h_ref, w_ref, o_ref):
    o_ref[...] = jnp.dot(
        h_ref[...], w_ref[...], preferred_element_type=jnp.float32
    ).astype(o_ref.dtype)


# ---------------------------------------------------------------------------
# Kernel 2: aggregation + epilogue     out = ReLU(A @ HW + b)
# Grid = (row tiles, compacted nonzero-source-tile list). The A / HW blocks
# fetched at step (i, t) are chosen by the scalar-prefetched cols table, so
# all-zero A tiles are never DMA'd from HBM.
# ---------------------------------------------------------------------------
def _aggregate_kernel(cols_ref, counts_ref, a_ref, hw_ref, b_ref, o_ref):
    del cols_ref  # consumed by the index_maps, not the body
    i = pl.program_id(0)   # destination-row tile
    t = pl.program_id(1)   # position in this row-tile's compacted tile list

    @pl.when(t == 0)
    def _init():
        o_ref[...] = jnp.zeros_like(o_ref)

    # Only live steps compute; padding steps revisit the same blocks (no DMA)
    # and fall through.
    @pl.when(t < counts_ref[i])
    def _accumulate():
        o_ref[...] += jnp.dot(
            a_ref[...], hw_ref[...], preferred_element_type=jnp.float32)

    @pl.when(t == pl.num_programs(1) - 1)
    def _finalize():
        o_ref[...] = jnp.maximum(o_ref[...] + b_ref[...], 0.0).astype(o_ref.dtype)


# ---------------------------------------------------------------------------
# Per-graph preprocessing (hoisted: compute ONCE per graph, reuse across
# layers / iterations). Host-side; the resulting grid extent is static.
# ---------------------------------------------------------------------------
def preprocess_adjacency(adj, tile_m, tile_k):
    """Compacted table of nonzero A tiles per destination row-tile.

    Returns:
      cols    [grid_m * max_nnz] int32  flattened source-tile indices
      counts  [grid_m]           int32  number of live tiles per row-tile
      max_nnz int                       reduction-axis grid extent
    Padding entries repeat the last live index (block revisit -> no DMA);
    row-tiles with zero live tiles point at tile 0 (fetched once, unused).
    """
    n = adj.shape[0]
    assert adj.shape == (n, n)
    assert n % tile_m == 0 and n % tile_k == 0, "pad N to the tile sizes"
    grid_m, grid_k = n // tile_m, n // tile_k

    nz = np.asarray(adj).reshape(grid_m, tile_m, grid_k, tile_k).any(axis=(1, 3))
    counts = nz.sum(axis=1).astype(np.int32)
    max_nnz = max(int(counts.max()), 1)
    cols = np.zeros((grid_m, max_nnz), dtype=np.int32)
    for i in range(grid_m):
        live = np.nonzero(nz[i])[0]
        if live.size:
            cols[i, : live.size] = live
            cols[i, live.size:] = live[-1]
    return jnp.asarray(cols.reshape(-1)), jnp.asarray(counts), max_nnz


# ---------------------------------------------------------------------------
# Layer forward
# ---------------------------------------------------------------------------
def gcn_layer(adj_c, cols, counts, max_nnz, feature, weight, bias, *,
              tile_m=256, tile_k=512, matmul_dtype=jnp.bfloat16):
    """GCN layer forward: ReLU(A @ (H @ W^T) + b).

    adj_c:   [N, N]        adjacency ALREADY cast to matmul_dtype (hoisted)
    cols, counts, max_nnz: from preprocess_adjacency(adj, tile_m, tile_k)
    feature: [N, F_in]     node features
    weight:  [F_out, F_in] nn.Linear weight;  bias: [F_out]
    returns  [N, F_out]
    """
    n, f_in = feature.shape
    f_out = weight.shape[0]
    assert adj_c.shape == (n, n)
    assert n % tile_m == 0 and n % tile_k == 0, "pad N to the tile sizes"
    grid_m = n // tile_m

    # Lane-dense epilogue: pad F_out up to a multiple of 128, slice off after.
    f_pad = max(128, ((f_out + 127) // 128) * 128)
    w_t = jnp.zeros((f_in, f_pad), matmul_dtype).at[:, :f_out].set(
        weight.T.astype(matmul_dtype))
    b_pad = jnp.zeros((1, f_pad), jnp.float32).at[:, :f_out].set(
        bias.astype(jnp.float32).reshape(1, f_out))

    # VMEM budget: A(2x double-buffered) + HW(2x) + resident f32 out tile.
    itemsize = jnp.dtype(matmul_dtype).itemsize
    vmem_need = (2 * tile_m * tile_k * itemsize
                 + 2 * tile_k * f_pad * itemsize
                 + 2 * tile_m * f_pad * 4
                 + (4 << 20))                         # headroom
    vmem_limit = int(min(max(vmem_need, 32 << 20), 56 << 20))  # fits v7x 64 MiB

    # ---- Step 1: HW = H @ W^T  (bf16 operands, f32 accumulation) -----------
    hw = pl.pallas_call(
        _project_kernel,
        out_shape=jax.ShapeDtypeStruct((n, f_pad), matmul_dtype),
        grid_spec=pltpu.PrefetchScalarGridSpec(
            num_scalar_prefetch=0,
            grid=(grid_m,),
            in_specs=[
                pl.BlockSpec((tile_m, f_in), lambda i: (i, 0)),
                pl.BlockSpec((f_in, f_pad), lambda i: (0, 0)),   # W resident
            ],
            out_specs=pl.BlockSpec((tile_m, f_pad), lambda i: (i, 0)),
        ),
        compiler_params=pltpu.CompilerParams(
            dimension_semantics=("parallel",),
            vmem_limit_bytes=vmem_limit),
    )(feature.astype(matmul_dtype), w_t)

    # ---- Step 2: out = ReLU(A @ HW + b) over the compacted live-tile list ---
    def a_map(i, t, cols_ref, counts_ref):
        return (i, cols_ref[i * max_nnz + t])

    def hw_map(i, t, cols_ref, counts_ref):
        return (cols_ref[i * max_nnz + t], 0)

    out_pad = pl.pallas_call(
        _aggregate_kernel,
        out_shape=jax.ShapeDtypeStruct((n, f_pad), jnp.float32),
        grid_spec=pltpu.PrefetchScalarGridSpec(
            num_scalar_prefetch=2,                    # cols, counts -> SMEM
            grid=(grid_m, max_nnz),                   # reduction axis last
            in_specs=[
                pl.BlockSpec((tile_m, tile_k), a_map),
                pl.BlockSpec((tile_k, f_pad), hw_map),
                pl.BlockSpec((1, f_pad), lambda i, t, c, cnt: (0, 0)),  # bias
            ],
            out_specs=pl.BlockSpec((tile_m, f_pad), lambda i, t, c, cnt: (i, 0)),
        ),
        compiler_params=pltpu.CompilerParams(
            dimension_semantics=("parallel", "arbitrary"),
            vmem_limit_bytes=vmem_limit),
    )(cols, counts, adj_c, hw, b_pad)

    return out_pad[:, :f_out]


if __name__ == "__main__":
    N = 1024          # nodes: 4 row tiles (256) x 2 source tiles (512)
    IN_FEATS = 64
    OUT_FEATS = 32
    TILE_M, TILE_K = 256, 512

    key = jax.random.PRNGKey(0)
    k_feat, k_adj, k_mask, k_w, k_b = jax.random.split(key, 5)

    # Node features.
    feature = jax.random.normal(k_feat, (N, IN_FEATS), dtype=jnp.float32)

    # Block-structured sparse weighted adjacency A[dst, src]:
    # tile-level mask over the 4x2 tile grid (rows with 1, 1, 2, 0 live tiles
    # -> exercises compacted, padded, full, and empty reduction lists),
    # ~10% element density inside live tiles.
    tile_mask = jnp.array([[1, 0],
                           [0, 1],
                           [1, 1],
                           [0, 0]], dtype=jnp.float32)
    block_mask = jnp.kron(tile_mask, jnp.ones((TILE_M, TILE_K), jnp.float32))
    edge_w = jax.random.uniform(k_adj, (N, N), dtype=jnp.float32)
    density = (jax.random.uniform(k_mask, (N, N)) < 0.1).astype(jnp.float32)
    adj = edge_w * density * block_mask

    # Deterministic nn.Linear-style init: U(-1/sqrt(in), 1/sqrt(in)).
    bound = 1.0 / math.sqrt(IN_FEATS)
    w = jax.random.uniform(k_w, (OUT_FEATS, IN_FEATS), dtype=jnp.float32,
                           minval=-bound, maxval=bound)
    b = jax.random.uniform(k_b, (OUT_FEATS,), dtype=jnp.float32,
                           minval=-bound, maxval=bound)

    # Pure-JAX reference (same association as the kernel: A @ (H @ W^T)).
    ref = jnp.maximum(adj @ (feature @ w.T) + b[None, :], 0.0)

    # Per-graph preprocessing, hoisted out of the layer (reused across calls).
    cols, counts, max_nnz = preprocess_adjacency(adj, TILE_M, TILE_K)

    # f32 matmul path: tight check of tiling / compacted reduction / epilogue.
    out_f32 = jax.block_until_ready(
        gcn_layer(adj, cols, counts, max_nnz, feature, w, b,
                  tile_m=TILE_M, tile_k=TILE_K, matmul_dtype=jnp.float32))
    assert out_f32.shape == (N, OUT_FEATS)
    assert jnp.allclose(out_f32, ref, atol=1e-3, rtol=1e-3)

    # bf16 matmul path (default perf config): f32 accumulation; error only
    # from the bf16 casts of A, H, W. Adjacency cast is done once per graph.
    adj_bf16 = adj.astype(jnp.bfloat16)
    out = jax.block_until_ready(
        gcn_layer(adj_bf16, cols, counts, max_nnz, feature, w, b,
                  tile_m=TILE_M, tile_k=TILE_K))
    assert out.shape == (N, OUT_FEATS)
    assert jnp.allclose(out, ref, atol=1e-1, rtol=5e-2)

    print("KERNEL_OK")
</pallas_src>

<mosaic_0001>
module attributes {stable_mosaic.version = 11 : i64} {
  func.func @_project_kernel(%arg0: i32, %arg1: memref<256x64xf32, #tpu.memory_space<vmem>>, %arg2: memref<64x128xf32, #tpu.memory_space<vmem>>, %arg3: memref<256x128xf32, #tpu.memory_space<vmem>>) attributes {dimension_semantics = [#tpu.dimension_semantics<parallel>], iteration_bounds = array<i64: 4>, scalar_prefetch = 0 : i64, scratch_operands = 0 : i64, tpu.core_type = #tpu.core_type<tc>, window_params = [{transform_indices = @transform_0, window_bounds = array<i64: 256, 64>}, {pipeline_mode = #tpu.pipeline_mode<synchronous>, transform_indices = @transform_1, window_bounds = array<i64: 64, 128>}, {transform_indices = @transform_2, window_bounds = array<i64: 256, 128>}]} {
    %c0 = arith.constant 0 : index
    %c0_0 = arith.constant 0 : index
    %0 = vector.load %arg1[%c0, %c0_0] : memref<256x64xf32, #tpu.memory_space<vmem>>, vector<256x64xf32>
    %c0_1 = arith.constant 0 : index
    %c0_2 = arith.constant 0 : index
    %1 = vector.load %arg2[%c0_1, %c0_2] : memref<64x128xf32, #tpu.memory_space<vmem>>, vector<64x128xf32>
    %cst = arith.constant dense<0.000000e+00> : vector<256x128xf32>
    %2 = tpu.matmul %0, %1, %cst {dimension_numbers = #tpu.dot_dimension_numbers<[1], [0], [0], [1], [0, 0, 1, 1], [], []>} : vector<256x64xf32>, vector<64x128xf32>, vector<256x128xf32> -> vector<256x128xf32>
    %c0_3 = arith.constant 0 : index
    %c0_4 = arith.constant 0 : index
    %3 = vector.load %arg3[%c0_3, %c0_4] : memref<256x128xf32, #tpu.memory_space<vmem>>, vector<256x128xf32>
    tpu.vector_store %arg3[%c0_3, %c0_4], %2 {strides = array<i32>} : memref<256x128xf32, #tpu.memory_space<vmem>>, vector<256x128xf32>,
    return
  }
  func.func @transform_0(%arg0: i32) -> (i32, i32) {
    %c0_i32 = arith.constant 0 : i32
    %c0_i32_0 = arith.constant 0 : i32
    return %arg0, %c0_i32 : i32, i32
  }
  func.func @transform_1(%arg0: i32) -> (i32, i32) {
    %c0_i32 = arith.constant 0 : i32
    %c0_i32_0 = arith.constant 0 : i32
    %c0_i32_1 = arith.constant 0 : i32
    return %c0_i32, %c0_i32_0 : i32, i32
  }
  func.func @transform_2(%arg0: i32) -> (i32, i32) {
    %c0_i32 = arith.constant 0 : i32
    %c0_i32_0 = arith.constant 0 : i32
    return %arg0, %c0_i32 : i32, i32
  }
}

</mosaic_0001>

<bundles_post_ra>
// kernel: tpu_custom_call.1
= control target key start
LH: loop header
LB: loop body
LE: loop exit
PB: predicated region body
PF: predicated region fallthrough
CT: control target
= control target key end

     0   :  { %7 = vsyncpa [#allocation3], 0  ;;  %s1142_s0 = inlined_call_operand.vmem [shape: f32[1024,64], index: 0, kind: input, shape index: {}]   ;;  %s1143_s1 = inlined_call_operand.vmem [shape: f32[64,128], index: 1, kind: input, shape index: {}]   ;;  %s1144_s2 = inlined_call_operand.hbm [shape: f32[1024,128], index: 2, kind: output, shape index: {}]  }
   0x1   :  { %9 = vsyncpa [#allocation3 + $0x1], 0  ;;  %s911_s9 = smov 0   ;;  %s913_s10 = smov 0  }
   0x2   :  { %s915_s11 = smov 0   ;;  %s917_s12 = smov 0  }
   0x3 LB: > { %s932_s13 = sadd.s32 4294967295, %s891_s12   ;;  %s615_s14 = sadd.s32 4294967294, %s891_s12   ;;  %s891_s12 = sphi %s917_s12, %s1150_s12   ;;  %s887_s11 = sphi %s915_s11, %s1149_s11   ;;  %s883_s10 = sphi %s913_s10, %s1148_s10   ;;  %s879_s9 = sphi %s911_s9, %s1147_s9  }
   0x4   : > { %s936_s15 = sadd.s32 1, %s891_s12   ;;  %s69_s16 = sadd.s32 1, %s887_s11 }
   0x5   : > { %s66_s17 = ssub.s32 %s891_s12, %s936_s15  ;;  %p79_p0 = scmp.ne.s32.totalorder %s887_s11, %s883_s10 }
   0x6   : > { %p67_p1 = scmp.eq.s32.totalorder %s66_s17, 0  ;;  %p80_p2 = scmp.eq.s32.totalorder %s932_s13, 3 }
   0x7   : > { %p85_p3 = scmp.ne.s32.totalorder %s883_s10, %s879_s9  ;;  %p86_p4 = scmp.eq.s32.totalorder %s615_s14, 3 }
   0x8   : > { %s947_s18 = scalar_select %p67_p1, %s887_s11, %s69_s16  }
   0x9   : > { %p949_p5 = por %p80_p2, %p79_p0  ;;  %p953_p6 = por %p86_p4, %p85_p3 }
   0xa   : > { %p618_p7 = scmp.ge.s32.totalorder %s891_s12, 1  ;;  %p116_p8 = scmp.lt.s32.totalorder %s891_s12, 5 }
   0xc   : > { %p117_p9 = pnand %p618_p7, %p116_p8 }
   0xd   : > { %v177_v0 = vld [vmem:[%s1143_s1] sm:$0xff] (!%p117_p9)  ;;  %v178_v1 = vld [vmem:[%s1143_s1 + $0x8] sm:$0xff] (!%p117_p9)  ;;  %v179_v2 = vld [vmem:[%s1143_s1 + $0x10] sm:$0xff] (!%p117_p9)  ;;  %s620_s27 = sshll.u32 (!%p117_p9), %s932_s13, 5  ;;  %vm185_vm0 = vcmask (!%p117_p9), 523264   ;;  %s135_s23 = sand.u32 (!%p117_p9), 1, %s883_s10  }
   0xe   : > { %120 = sbr.rel (%p117_p9) target bundleno = 289 (0x121), region = 28  ;;  %v764_v3 = vpack.c.bf16 (!%p117_p9), %v178_v1, %v177_v0  ;;  %v180_v4 = vld [vmem:[%s1143_s1 + $0x18] sm:$0xff] (!%p117_p9)  ;;  %p139_p10 = scmp.lt.s32.totalorder (!%p117_p9), %s620_s27, 127  ;;  %v181_v6 = vld [vmem:[%s1143_s1 + $0x20] sm:$0xff] (!%p117_p9)  ;;  %v182_v7 = vld [vmem:[%s1143_s1 + $0x28] sm:$0xff] (!%p117_p9) }
   0xf   : > { %v768_v5 = vpack.c.bf16 (!%p117_p9), %v180_v4, %v179_v2  ;;  %v772_v8 = vpack.c.bf16 (!%p117_p9), %v182_v7, %v181_v6  ;;  %v183_v9 = vld [vmem:[%s1143_s1 + $0x30] sm:$0xff] (!%p117_p9)  ;;  %v184_v10 = vld [vmem:[%s1143_s1 + $0x38] sm:$0xff] (!%p117_p9)  ;;  %s619_s24 = sshll.u32 (!%p117_p9), %s135_s23, 8  ;;  %s659_s26 = sshll.u32 (!%p117_p9), %s932_s13, 12 }
  0x10   : > { %765 = vmatprep.subr.bf16.mxu0 (!%p117_p9), %v764_v3  ;;  %780 = vmatprep.subr.bf16.mxu1 (!%p117_p9), %v764_v3  ;;  %v776_v13 = vpack.c.bf16 (!%p117_p9), %v184_v10, %v183_v9  ;;  %s1056_s25 = scalar_lea.vmem (!%p117_p9), [#allocation2], %s619_s24  ;;  %s1091_s30 = scalar_lea.hbm (!%p117_p9), %s1144_s2, %s659_s26 }
  0x11   : > { %767 = vmatpush3.bf16.msra.mxu0 (!%p117_p9), %v764_v3  ;;  %784 = vmatpush3.bf16.msra.mxu1 (!%p117_p9), %v764_v3  ;;  %s1101_s13 = scalar_lea.sflag (!%p117_p9), [#allocation3], %s135_s23  ;;  %s893_s4 = smov (!%p117_p9), [#allocation2]  }
  0x12   : > { %769 = vmatprep.subr.bf16.mxu0 (!%p117_p9), %v768_v5  ;;  %781 = vmatprep.subr.bf16.mxu1 (!%p117_p9), %v768_v5  ;;  %s833_s5 = sshll.u32 (!%p117_p9), %s893_s4, 4  ;;  %s834_s5 = int_to_ptr.vmem [resolvable:$false] %s833_s5 }
  0x15   : > { %s1152_s27 = smov (!%p139_p10, %s620_s27), 127  ;;  %771 = vmatpush3.bf16.msra.mxu0 %v768_v5  ;;  %785 = vmatpush3.bf16.msra.mxu1 %v768_v5 }
  0x16   : > { %s621_s6 = sshll.u32 %s1152_s27, 3  ;;  %773 = vmatprep.subr.bf16.mxu0 %v772_v8  ;;  %782 = vmatprep.subr.bf16.mxu1 %v772_v8  ;;  %s553_s27 = sshll.u32 %s1056_s25, 4  ;;  %s1093_s27 = int_to_ptr.vmem [resolvable:$true] %s553_s27 }
  0x17   : > { %s987_s22 = scalar_lea.vmem %s1142_s0, %s621_s6  ;;  %s829_s3 = scalar_lea.vmem %s1093_s27, 4096 }
  0x18   : > { %v145_v11 = vld [vmem:[%s987_s22] sm:$0xff]  ;;  %v146_v14 = vld [vmem:[%s987_s22 + $0x8] sm:$0xff]  ;;  %v147_v16 = vld [vmem:[%s987_s22 + $0x10] sm:$0xff]  ;;  %p830_p11 = scmp.ne.s32.totalorder %s1093_s27, %s829_s3  ;;  %s835_s6 = scalar_lea.vmem %s834_s5, 8192 }
  0x19   : > { %v161_v12 = vld [vmem:[%s987_s22 + $0x80] sm:$0xff]  ;;  %716 = vmatprep.mubr.msk.f32.mxu0 %vm185_vm0, %v145_v11  ;;  %775 = vmatpush3.bf16.msra.mxu0 %v772_v8  ;;  %v162_v15 = vld [vmem:[%s987_s22 + $0x88] sm:$0xff]  ;;  %v163_v17 = vld [vmem:[%s987_s22 + $0x90] sm:$0xff]  ;;  %p836_p0 = scmp.lt.s32.totalorder %s1093_s27, %s834_s5  ;;  %p837_p1 = scmp.lt.s32.totalorder %s835_s6, %s829_s3 }
  0x1a   : > { %740 = vmatprep.mubr.msk.f32.mxu1 %vm185_vm0, %v161_v12  ;;  %786 = vmatpush3.bf16.msra.mxu1 %v772_v8  ;;  %v148_v18 = vld [vmem:[%s987_s22 + $0x18] sm:$0xff]  ;;  %v149_v20 = vld [vmem:[%s987_s22 + $0x20] sm:$0xff]  ;;  %v150_v22 = vld [vmem:[%s987_s22 + $0x28] sm:$0xff]  ;;  %p831_p12 = pnand %p830_p11, %p949_p5 }
  0x1b   : > { %777 = vmatprep.subr.bf16.mxu0 %v776_v13  ;;  %783 = vmatprep.subr.bf16.mxu1 %v776_v13  ;;  %v164_v19 = vld [vmem:[%s987_s22 + $0x98] sm:$0xff]  ;;  %v165_v21 = vld [vmem:[%s987_s22 + $0xa0] sm:$0xff]  ;;  %v166_v23 = vld [vmem:[%s987_s22 + $0xa8] sm:$0xff]  ;;  %p838_p2 = por %p837_p1, %p836_p0 }
  0x1c   : > { %v151_v24 = vld [vmem:[%s987_s22 + $0x30] sm:$0xff]  ;;  %v152_v26 = vld [vmem:[%s987_s22 + $0x38] sm:$0xff]  ;;  %v153_v28 = vld [vmem:[%s987_s22 + $0x40] sm:$0xff]  ;;  %p832_p13 = pneg %p831_p12 }
  0x1d   : > { %779 = vmatpush3.bf16.msra.mxu0 %v776_v13  ;;  %v167_v25 = vld [vmem:[%s987_s22 + $0xb0] sm:$0xff]  ;;  %v168_v27 = vld [vmem:[%s987_s22 + $0xb8] sm:$0xff]  ;;  %v169_v29 = vld [vmem:[%s987_s22 + $0xc0] sm:$0xff] }
  0x1e   : > { %787 = vmatpush3.bf16.msra.mxu1 %v776_v13  ;;  %v154_v30 = vld [vmem:[%s987_s22 + $0x48] sm:$0xff]  ;;  %v155_v32 = vld [vmem:[%s987_s22 + $0x50] sm:$0xff]  ;;  %v156_v34 = vld [vmem:[%s987_s22 + $0x58] sm:$0xff]  ;;  %p839_p3 = pnand %p838_p2, %p832_p13 }
  0x1f   : > { %v170_v31 = vld [vmem:[%s987_s22 + $0xc8] sm:$0xff]  ;;  %v171_v33 = vld [vmem:[%s987_s22 + $0xd0] sm:$0xff]  ;;  %v172_v35 = vld [vmem:[%s987_s22 + $0xd8] sm:$0xff] }
  0x20   : > { %717 = vmatmul.mubr.msk.f32.vlgmr.msra.gmra.mrb[0].mxu0 %vm185_vm0, %v146_v14  ;;  %v157_v36 = vld [vmem:[%s987_s22 + $0x60] sm:$0xff]  ;;  %v158_v38 = vld [vmem:[%s987_s22 + $0x68] sm:$0xff]  ;;  %v159_v40 = vld [vmem:[%s987_s22 + $0x70] sm:$0xff] }
  0x21   : > { %741 = vmatmul.mubr.msk.f32.vlgmr.msra.gmra.mrb[0].mxu1 %vm185_vm0, %v162_v15  ;;  %719 = vmatprep.mubr.msk.f32.mxu0 %vm185_vm0, %v147_v16  ;;  %v173_v37 = vld [vmem:[%s987_s22 + $0xe0] sm:$0xff]  ;;  %v174_v39 = vld [vmem:[%s987_s22 + $0xe8] sm:$0xff]  ;;  %v175_v41 = vld [vmem:[%s987_s22 + $0xf0] sm:$0xff] }
  0x22   : > { %743 = vmatprep.mubr.msk.f32.mxu1 %vm185_vm0, %v163_v17  ;;  %v160_v42 = vld [vmem:[%s987_s22 + $0x78] sm:$0xff] }
  0x23   : > { %v176_v43 = vld [vmem:[%s987_s22 + $0xf8] sm:$0xff] }
  0x24   : > { %720 = vmatmul.mubr.msk.f32.gmra.mrb[2].mxu0 %vm185_vm0, %v148_v18 }
  0x25   : > { %744 = vmatmul.mubr.msk.f32.gmra.mrb[2].mxu1 %vm185_vm0, %v164_v19  ;;  %722 = vmatprep.mubr.msk.f32.mxu0 %vm185_vm0, %v149_v20 }
  0x26   : > { %746 = vmatprep.mubr.msk.f32.mxu1 %vm185_vm0, %v165_v21 }
  0x28   : > { %723 = vmatmul.mubr.msk.f32.gmra.mrb[4].mxu0 %vm185_vm0, %v150_v22 }
  0x29   : > { %747 = vmatmul.mubr.msk.f32.gmra.mrb[4].mxu1 %vm185_vm0, %v166_v23  ;;  %725 = vmatprep.mubr.msk.f32.mxu0 %vm185_vm0, %v151_v24 }
  0x2a   : > { %749 = vmatprep.mubr.msk.f32.mxu1 %vm185_vm0, %v167_v25 }
  0x2c   : > { %726 = vmatmul.mubr.msk.f32.gmra.mrb[6].mxu0 %vm185_vm0, %v152_v26 }
  0x2d   : > { %750 = vmatmul.mubr.msk.f32.gmra.mrb[6].mxu1 %vm185_vm0, %v168_v27  ;;  %728 = vmatprep.mubr.msk.f32.mxu0 %vm185_vm0, %v153_v28 }
  0x2e   : > { %752 = vmatprep.mubr.msk.f32.mxu1 %vm185_vm0, %v169_v29 }
  0x30   : > { %729 = vmatmul.mubr.msk.f32.gmra.mrb[8].mxu0 %vm185_vm0, %v154_v30 }
  0x31   : > { %753 = vmatmul.mubr.msk.f32.gmra.mrb[8].mxu1 %vm185_vm0, %v170_v31  ;;  %731 = vmatprep.mubr.msk.f32.mxu0 %vm185_vm0, %v155_v32 }
  0x32   : > { %755 = vmatprep.mubr.msk.f32.mxu1 %vm185_vm0, %v171_v33 }
  0x34   : > { %732 = vmatmul.mubr.msk.f32.gmra.mrb[10].mxu0 %vm185_vm0, %v156_v34 }
  0x35   : > { %756 = vmatmul.mubr.msk.f32.gmra.mrb[10].mxu1 %vm185_vm0, %v172_v35  ;;  %734 = vmatprep.mubr.msk.f32.mxu0 %vm185_vm0, %v157_v36 }
  0x36   : > { %758 = vmatprep.mubr.msk.f32.mxu1 %vm185_vm0, %v173_v37 }
  0x38   : > { %735 = vmatmul.mubr.msk.f32.gmra.mrb[12].mxu0 %vm185_vm0, %v158_v38 }
  0x39   : > { %759 = vmatmul.mubr.msk.f32.gmra.mrb[12].mxu1 %vm185_vm0, %v174_v39  ;;  %737 = vmatprep.mubr.msk.f32.mxu0 %vm185_vm0, %v159_v40 }
  0x3a   : > { %761 = vmatprep.mubr.msk.f32.mxu1 %vm185_vm0, %v175_v41 }
  0x3c   : > { %738 = vmatmul.mubr.msk.f32.gmra.mrb[14].mxu0 %vm185_vm0, %v160_v42 }
  0x3d   : > { %762 = vmatmul.mubr.msk.f32.gmra.mrb[14].mxu1 %vm185_vm0, %v176_v43 }
  0xf3   : > { %v718_v44 = vpop.f32.mrb[0].mxu0 }
  0xf4   : > { %v742_v45 = vpop.f32.mrb[0].mxu1  ;;  %508 = vst [vmem:[%s1056_s25 + $0x8] sm:$0xff] %v718_v44  ;;  %v348_v46 = vpop.f32.mrb[1].mxu0 }
  0xf5   : > { %524 = vst [vmem:[%s1056_s25 + $0x88] sm:$0xff] %v742_v45  ;;  %v428_v47 = vpop.f32.mrb[1].mxu1  ;;  %507 = vst [vmem:[%s1056_s25] sm:$0xff] %v348_v46 }
  0xf6   : > { %523 = vst [vmem:[%s1056_s25 + $0x80] sm:$0xff] %v428_v47 }
  0xf7   : > { %v721_v48 = vpop.f32.mrb[2].mxu0 }
  0xf8   : > { %v745_v49 = vpop.f32.mrb[2].mxu1  ;;  %510 = vst [vmem:[%s1056_s25 + $0x18] sm:$0xff] %v721_v48  ;;  %v358_v50 = vpop.f32.mrb[3].mxu0 }
  0xf9   : > { %526 = vst [vmem:[%s1056_s25 + $0x98] sm:$0xff] %v745_v49  ;;  %v438_v51 = vpop.f32.mrb[3].mxu1  ;;  %509 = vst [vmem:[%s1056_s25 + $0x10] sm:$0xff] %v358_v50 }
  0xfa   : > { %525 = vst [vmem:[%s1056_s25 + $0x90] sm:$0xff] %v438_v51 }
  0xfb   : > { %v724_v52 = vpop.f32.mrb[4].mxu0 }
  0xfc   : > { %v748_v53 = vpop.f32.mrb[4].mxu1  ;;  %512 = vst [vmem:[%s1056_s25 + $0x28] sm:$0xff] %v724_v52  ;;  %v368_v54 = vpop.f32.mrb[5].mxu0 }
  0xfd   : > { %528 = vst [vmem:[%s1056_s25 + $0xa8] sm:$0xff] %v748_v53  ;;  %v448_v55 = vpop.f32.mrb[5].mxu1  ;;  %511 = vst [vmem:[%s1056_s25 + $0x20] sm:$0xff] %v368_v54 }
  0xfe   : > { %527 = vst [vmem:[%s1056_s25 + $0xa0] sm:$0xff] %v448_v55 }
  0xff   : > { %v727_v56 = vpop.f32.mrb[6].mxu0 }
 0x100   : > { %v751_v57 = vpop.f32.mrb[6].mxu1  ;;  %514 = vst [vmem:[%s1056_s25 + $0x38] sm:$0xff] %v727_v56  ;;  %v378_v58 = vpop.f32.mrb[7].mxu0 }
 0x101   : > { %530 = vst [vmem:[%s1056_s25 + $0xb8] sm:$0xff] %v751_v57  ;;  %v458_v59 = vpop.f32.mrb[7].mxu1  ;;  %513 = vst [vmem:[%s1056_s25 + $0x30] sm:$0xff] %v378_v58 }
 0x102   : > { %529 = vst [vmem:[%s1056_s25 + $0xb0] sm:$0xff] %v458_v59 }
 0x103   : > { %v730_v60 = vpop.f32.mrb[8].mxu0 }
 0x104   : > { %v754_v61 = vpop.f32.mrb[8].mxu1  ;;  %516 = vst [vmem:[%s1056_s25 + $0x48] sm:$0xff] %v730_v60  ;;  %v388_v62 = vpop.f32.mrb[9].mxu0 }
 0x105   : > { %532 = vst [vmem:[%s1056_s25 + $0xc8] sm:$0xff] %v754_v61  ;;  %v468_v63 = vpop.f32.mrb[9].mxu1  ;;  %515 = vst [vmem:[%s1056_s25 + $0x40] sm:$0xff] %v388_v62 }
 0x106   : > { %531 = vst [vmem:[%s1056_s25 + $0xc0] sm:$0xff] %v468_v63 }
 0x107   : > { %v733_v0 = vpop.f32.mrb[10].mxu0 }
 0x108   : > { %v757_v1 = vpop.f32.mrb[10].mxu1  ;;  %518 = vst [vmem:[%s1056_s25 + $0x58] sm:$0xff] %v733_v0  ;;  %v398_v2 = vpop.f32.mrb[11].mxu0 }
 0x109   : > { %534 = vst [vmem:[%s1056_s25 + $0xd8] sm:$0xff] %v757_v1  ;;  %v478_v3 = vpop.f32.mrb[11].mxu1  ;;  %517 = vst [vmem:[%s1056_s25 + $0x50] sm:$0xff] %v398_v2 }
 0x10a   : > { %533 = vst [vmem:[%s1056_s25 + $0xd0] sm:$0xff] %v478_v3 }
 0x10b   : > { %v736_v4 = vpop.f32.mrb[12].mxu0 }
 0x10c   : > { %v760_v5 = vpop.f32.mrb[12].mxu1  ;;  %520 = vst [vmem:[%s1056_s25 + $0x68] sm:$0xff] %v736_v4  ;;  %v408_v6 = vpop.f32.mrb[13].mxu0 }
 0x10d   : > { %536 = vst [vmem:[%s1056_s25 + $0xe8] sm:$0xff] %v760_v5  ;;  %v488_v7 = vpop.f32.mrb[13].mxu1  ;;  %519 = vst [vmem:[%s1056_s25 + $0x60] sm:$0xff] %v408_v6 }
 0x10e   : > { %535 = vst [vmem:[%s1056_s25 + $0xe0] sm:$0xff] %v488_v7 }
 0x10f   : > { %v739_v8 = vpop.f32.mrb[14].mxu0 }
 0x110   : > { %v763_v9 = vpop.f32.mrb[14].mxu1  ;;  %522 = vst [vmem:[%s1056_s25 + $0x78] sm:$0xff] %v739_v8  ;;  %v418_v10 = vpop.f32.mrb[15].mxu0 }
 0x111   : > { %538 = vst [vmem:[%s1056_s25 + $0xf8] sm:$0xff] %v763_v9  ;;  %v498_v11 = vpop.f32.mrb[15].mxu1  ;;  %521 = vst [vmem:[%s1056_s25 + $0x70] sm:$0xff] %v418_v10 }
 0x112   : > { %537 = vst [vmem:[%s1056_s25 + $0xf0] sm:$0xff] %v498_v11 }
 0x113   : > { %842 = shalt.err (!%p839_p3)
}
 0x114   : > { %s843_s7 = scalar_lea.hbm %s1091_s30, 4096  ;;  %s847_s16 = scalar_lea.hbm %s1144_s2, 16384 }
 0x115   : > { %p844_p4 = scmp.ne.s32.totalorder %s1091_s30, %s843_s7  ;;  %p848_p9 = scmp.lt.u32.totalorder %s1091_s30, %s1144_s2 }
 0x116   : > { %p849_p10 = scmp.lt.u32.totalorder %s847_s16, %s843_s7  ;;  %p851_p12 = scmp.lt.u32.totalorder %s843_s7, %s1091_s30 }
 0x117   : > { %p845_p7 = pnand %p844_p4, %p949_p5 }
 0x118   : > { %p850_p11 = por %p849_p10, %p848_p9 }
 0x119   : > { %p846_p8 = pneg %p845_p7 }
 0x11a   : > { %p852_p13 = por %p851_p12, %p850_p11 }
 0x11c   : > { %p853_p0 = pnand %p852_p13, %p846_p8 }
 0x11e   : > { %856 = shalt.err (!%p853_p0)
}
 0x11f   : > { %s894_s22 = smov 128   ;;  %s895_s23 = smov 8  }
 0x120   : > { %788 = dma.vmem_to_hbm [thread:$0]  (%p949_p5), %s1093_s27, 4096, %s1091_s30, %s1101_s13, %s894_s22, %s894_s22, %s895_s23  }
 0x121 PF: > { %p794_p1 = scmp.ge.s32.totalorder %s891_s12, 2  ;;  %s568_s24 = sand.u32 1, %s879_s9  }
 0x122   : > { %s569_s25 = scalar_lea.sflag [#allocation3], %s568_s24 }
 0x123   : > { %p791_p2 = pnand %p794_p1, %p953_p6 }
 0x125   : > { %874 = dma.done.wait (!%p791_p2), %s569_s25, 4096  }
 0x126   : > { %876 = vsyncadd (!%p791_p2), %s569_s25, 4294963200  ;;  %p12_p3 = scmp.ge.s32.totalorder %s936_s15, 6   ;;  %s1147_s9 = smov %s883_s10 }
 0x127   : > { %s1148_s10 = smov %s887_s11  ;;  %s1149_s11 = smov %s947_s18 }
 0x128   : > { %s1150_s12 = smov %s936_s15  ;;  %14 = sbr.rel (!%p12_p3) target bundleno = 3 (0x3), region = 63 }
 0x12f   :  { %574 = vsyncpa [#allocation3], 1 }
 0x130   :  { %576 = vsyncpa [#allocation3 + $0x1], 1 }

</bundles_post_ra>
